<compile_context>
chip_gen: v7x
topology: tpu7x:2x2x1
jax: 0.10.0
libtpu: 0.0.40
codegen_flags: <defaults>
</compile_context>

<pallas_src>
import math

import jax
import jax.numpy as jnp
from jax.experimental import pallas as pl
from jax.experimental.pallas import tpu as pltpu

IN_FEATURES = 784
OUT_FEATURES = 10

# Below this batch size everything comfortably fits in VMEM in one shot and a
# grid's pipeline prologue/epilogue (+ ~0.35us/step) is pure overhead.
_GRIDLESS_MAX_BATCH = 512


def linear_kernel(x_ref, w_ref, b_ref, o_ref):
    # x_ref: (TB, 784) compute dtype, w_ref: (784, 10) compute dtype,
    # b_ref: (1, 10) f32.  y = x @ w_t + b, accumulated in f32 on the MXU.
    acc = jnp.dot(x_ref[...], w_ref[...], preferred_element_type=jnp.float32)
    # TODO(synk): a downstream log_softmax / NLL loss could be fused here on
    # the otherwise-idle EUP slot, but the reference module returns raw logits.
    o_ref[...] = (acc + b_ref[...]).astype(o_ref.dtype)


def mnist_logistic_forward(x, w, b, *, batch_tile=2048,
                           compute_dtype=jnp.bfloat16):
    """y = x @ w.T + b with PyTorch nn.Linear semantics (w is (10, 784))."""
    B = x.shape[0]
    out_dtype = x.dtype
    assert batch_tile % 8 == 0, "batch_tile must be a multiple of 8 (sublanes)"

    # One-time prep outside the kernel: MXU input dtype, lane-friendly
    # (784, 10) weight layout; bias stays f32 for the post-accumulation add.
    x_c = x.astype(compute_dtype)
    w_t = jnp.transpose(w).astype(compute_dtype)            # (784, 10)
    b2 = b.reshape(1, OUT_FEATURES).astype(jnp.float32)

    itemsize = jnp.dtype(compute_dtype).itemsize
    cost = pl.CostEstimate(
        flops=2 * B * IN_FEATURES * OUT_FEATURES,
        transcendentals=0,
        bytes_accessed=(B * IN_FEATURES * itemsize
                        + IN_FEATURES * OUT_FEATURES * itemsize
                        + OUT_FEATURES * 4
                        + B * OUT_FEATURES * jnp.dtype(out_dtype).itemsize),
    )
    out_shape = jax.ShapeDtypeStruct((B, OUT_FEATURES), out_dtype)

    if B <= _GRIDLESS_MAX_BATCH:
        # Tiny batch: whole problem fits in VMEM; no grid, no pipelining.
        return pl.pallas_call(
            linear_kernel,
            out_shape=out_shape,
            in_specs=[
                pl.BlockSpec(memory_space=pltpu.MemorySpace.VMEM),
                pl.BlockSpec(memory_space=pltpu.MemorySpace.VMEM),
                pl.BlockSpec(memory_space=pltpu.MemorySpace.VMEM),
            ],
            out_specs=pl.BlockSpec(memory_space=pltpu.MemorySpace.VMEM),
            cost_estimate=cost,
        )(x_c, w_t, b2)

    # Large batch: ragged batch tiling (Pallas masks the partial last block's
    # output writes, so padded rows are never written back).  Weight and bias
    # are VMEM-resident (constant index_map, never re-DMA'd); the batch axis
    # is "parallel" so megacore / v7x's two TensorCores both get blocks.
    return pl.pallas_call(
        linear_kernel,
        out_shape=out_shape,
        grid=(pl.cdiv(B, batch_tile),),
        in_specs=[
            pl.BlockSpec((batch_tile, IN_FEATURES), lambda i: (i, 0)),
            pl.BlockSpec((IN_FEATURES, OUT_FEATURES), lambda i: (0, 0)),
            pl.BlockSpec((1, OUT_FEATURES), lambda i: (0, 0)),
        ],
        out_specs=pl.BlockSpec((batch_tile, OUT_FEATURES), lambda i: (i, 0)),
        compiler_params=pltpu.CompilerParams(
            dimension_semantics=("parallel",)),
        cost_estimate=cost,
    )(x_c, w_t, b2)


if __name__ == "__main__":
    key = jax.random.PRNGKey(0)
    k_x, k_w, k_b, k_x2 = jax.random.split(key, 4)

    # nn.Linear default init: U(-1/sqrt(fan_in), 1/sqrt(fan_in)).
    bound = 1.0 / math.sqrt(IN_FEATURES)
    w = jax.random.uniform(k_w, (OUT_FEATURES, IN_FEATURES), dtype=jnp.float32,
                           minval=-bound, maxval=bound)
    b = jax.random.uniform(k_b, (OUT_FEATURES,), dtype=jnp.float32,
                           minval=-bound, maxval=bound)

    # 1) Reference batch (B = 64, same as the PyTorch script): gridless VMEM
    #    path, default bf16 inputs with f32 MXU accumulation.
    B = 64
    x = jax.random.normal(k_x, (B, IN_FEATURES), dtype=jnp.float32)
    y = mnist_logistic_forward(x, w, b)
    jax.block_until_ready(y)
    assert y.shape == (B, OUT_FEATURES) and y.dtype == jnp.float32
    # Reference with the same bf16 input rounding (accumulation stays f32).
    x_bf = x.astype(jnp.bfloat16).astype(jnp.float32)
    w_bf = w.astype(jnp.bfloat16).astype(jnp.float32)
    y_ref_bf = x_bf @ w_bf.T + b
    assert jnp.allclose(y, y_ref_bf, atol=2e-3, rtol=2e-3)

    # 2) Same batch through the f32 compute path: exact check vs x @ w.T + b.
    y32 = mnist_logistic_forward(x, w, b, compute_dtype=jnp.float32)
    jax.block_until_ready(y32)
    assert jnp.allclose(y32, x @ w.T + b, atol=1e-5, rtol=1e-5)

    # 3) Larger, NON-multiple batch to exercise the ragged tiled grid path
    #    (600 rows, tile 256 -> 3 grid steps, last block partial and masked).
    B2 = 600
    x2 = jax.random.normal(k_x2, (B2, IN_FEATURES), dtype=jnp.float32)
    y2 = mnist_logistic_forward(x2, w, b, batch_tile=256,
                                compute_dtype=jnp.float32)
    jax.block_until_ready(y2)
    assert y2.shape == (B2, OUT_FEATURES)
    assert jnp.allclose(y2, x2 @ w.T + b, atol=1e-5, rtol=1e-5)

    print("KERNEL_OK")
</pallas_src>

<mosaic_0001>
module attributes {stable_mosaic.version = 11 : i64} {
  func.func @linear_kernel(%arg0: memref<64x784xbf16, #tpu.memory_space<vmem>>, %arg1: memref<784x10xbf16, #tpu.memory_space<vmem>>, %arg2: memref<1x10xf32, #tpu.memory_space<vmem>>, %arg3: memref<64x10xf32, #tpu.memory_space<vmem>>) attributes {dimension_semantics = [], scalar_prefetch = 0 : i64, scratch_operands = 0 : i64, tpu.core_type = #tpu.core_type<tc>} {
    %c0 = arith.constant 0 : index
    %c0_0 = arith.constant 0 : index
    %0 = vector.load %arg0[%c0, %c0_0] : memref<64x784xbf16, #tpu.memory_space<vmem>>, vector<64x784xbf16>
    %c0_1 = arith.constant 0 : index
    %c0_2 = arith.constant 0 : index
    %1 = vector.load %arg1[%c0_1, %c0_2] : memref<784x10xbf16, #tpu.memory_space<vmem>>, vector<784x10xbf16>
    %cst = arith.constant dense<0.000000e+00> : vector<64x10xf32>
    %2 = tpu.matmul %0, %1, %cst {dimension_numbers = #tpu.dot_dimension_numbers<[1], [0], [0], [1], [0, 0, 1, 1], [], []>} : vector<64x784xbf16>, vector<784x10xbf16>, vector<64x10xf32> -> vector<64x10xf32>
    %c0_3 = arith.constant 0 : index
    %c0_4 = arith.constant 0 : index
    %3 = vector.load %arg2[%c0_3, %c0_4] : memref<1x10xf32, #tpu.memory_space<vmem>>, vector<1x10xf32>
    %4 = vector.broadcast %3 : vector<1x10xf32> to vector<64x10xf32>
    %5 = arith.addf %2, %4 : vector<64x10xf32>
    %c0_5 = arith.constant 0 : index
    %c0_6 = arith.constant 0 : index
    %6 = vector.load %arg3[%c0_5, %c0_6] : memref<64x10xf32, #tpu.memory_space<vmem>>, vector<64x10xf32>
    tpu.vector_store %arg3[%c0_5, %c0_6], %5 {strides = array<i32>} : memref<64x10xf32, #tpu.memory_space<vmem>>, vector<64x10xf32>,
    return
  }
}

</mosaic_0001>

<bundles_post_ra>
// kernel: tpu_custom_call.1
= control target key start
LH: loop header
LB: loop body
LE: loop exit
PB: predicated region body
PF: predicated region fallthrough
CT: control target
= control target key end

     0   :  { %vm586_vm0 = vcmask 130048   ;;  %vm859_vm1 = vcmask 80896   ;;  %s1496_s1 = inlined_call_operand.vmem [shape: bf16[784,10], index: 1, kind: input, shape index: {}]   ;;  %s1497_s0 = inlined_call_operand.vmem [shape: bf16[64,784], index: 0, kind: input, shape index: {}]   ;;  %s1498_s2 = inlined_call_operand.vmem [shape: f32[1,10], index: 2, kind: input, shape index: {}]   ;;  %s1499_s3 = inlined_call_operand.vmem [shape: f32[64,10], index: 3, kind: output, shape index: {}]  }
   0x1   :  { %v1105_v0 = vld [vmem:[%s1496_s1 + $0x40] sm:$0xff]   ;;  %v1109_v4 = vld [vmem:[%s1496_s1 + $0x48] sm:$0xff]   ;;  %v1113_v8 = vld [vmem:[%s1496_s1 + $0x50] sm:$0xff]  }
   0x2   :  { %v1106_v1 = vld [vmem:[%s1496_s1 + $0xc0] sm:$0xff]   ;;  %954 = vmatprep.subr.bf16.mxu0 %v1105_v0  ;;  %v1110_v5 = vld [vmem:[%s1496_s1 + $0xc8] sm:$0xff]   ;;  %v1114_v9 = vld [vmem:[%s1496_s1 + $0xd0] sm:$0xff]  }
   0x3   :  { %v1107_v2 = vld [vmem:[%s1496_s1] sm:$0xff]   ;;  %994 = vmatprep.subr.bf16.mxu1 %v1106_v1  ;;  %v1111_v6 = vld [vmem:[%s1496_s1 + $0x8] sm:$0xff]   ;;  %v1115_v10 = vld [vmem:[%s1496_s1 + $0x10] sm:$0xff]  }
   0x4   :  { %v1108_v3 = vld [vmem:[%s1496_s1 + $0x80] sm:$0xff]   ;;  %955 = vmatpush3.bf16.msra.mxu0 %v1107_v2  ;;  %v1112_v7 = vld [vmem:[%s1496_s1 + $0x88] sm:$0xff]   ;;  %v1116_v11 = vld [vmem:[%s1496_s1 + $0x90] sm:$0xff]  }
   0x5   :  { %995 = vmatpush3.bf16.msra.mxu1 %v1108_v3  ;;  %956 = vmatprep.subr.bf16.mxu0 %v1109_v4  ;;  %v1117_v12 = vld [vmem:[%s1496_s1 + $0x58] sm:$0xff]   ;;  %v1121_v16 = vld [vmem:[%s1496_s1 + $0x60] sm:$0xff]   ;;  %v1125_v20 = vld [vmem:[%s1496_s1 + $0x68] sm:$0xff]  }
   0x6   :  { %996 = vmatprep.subr.bf16.mxu1 %v1110_v5  ;;  %v1118_v13 = vld [vmem:[%s1496_s1 + $0xd8] sm:$0xff]   ;;  %v1122_v17 = vld [vmem:[%s1496_s1 + $0xe0] sm:$0xff]   ;;  %v1126_v21 = vld [vmem:[%s1496_s1 + $0xe8] sm:$0xff]  }
   0x7   :  { %v1119_v14 = vld [vmem:[%s1496_s1 + $0x18] sm:$0xff]   ;;  %v1123_v18 = vld [vmem:[%s1496_s1 + $0x20] sm:$0xff]   ;;  %v1127_v22 = vld [vmem:[%s1496_s1 + $0x28] sm:$0xff]  }
   0x8   :  { %957 = vmatpush3.bf16.msra.mxu0 %v1111_v6  ;;  %v1120_v15 = vld [vmem:[%s1496_s1 + $0x98] sm:$0xff]   ;;  %v1124_v19 = vld [vmem:[%s1496_s1 + $0xa0] sm:$0xff]   ;;  %v1128_v23 = vld [vmem:[%s1496_s1 + $0xa8] sm:$0xff]  }
   0x9   :  { %997 = vmatpush3.bf16.msra.mxu1 %v1112_v7  ;;  %958 = vmatprep.subr.bf16.mxu0 %v1113_v8  ;;  %v1129_v24 = vld [vmem:[%s1496_s1 + $0x70] sm:$0xff]   ;;  %v1133_v28 = vld [vmem:[%s1496_s1 + $0x78] sm:$0xff]   ;;  %v1139_v33 = vld [vmem:[%s1497_s0 + $0x4] ss:$28 sps:$4 sm:$0xff]  }
   0xa   :  { %998 = vmatprep.subr.bf16.mxu1 %v1114_v9  ;;  %v1130_v25 = vld [vmem:[%s1496_s1 + $0xf0] sm:$0xff]   ;;  %v1134_v29 = vld [vmem:[%s1496_s1 + $0xf8] sm:$0xff]   ;;  %v1140_v34 = vld [vmem:[%s1497_s0 + $0x8] ss:$28 sps:$4 sm:$0xff]   ;;  %631 = vmatprep.mubr.bf16.mxu0 %v1139_v33 }
   0xb   :  { %v1131_v26 = vld [vmem:[%s1496_s1 + $0x30] sm:$0xff]   ;;  %v1135_v30 = vld [vmem:[%s1496_s1 + $0x38] sm:$0xff]   ;;  %v1142_v35 = vld [vmem:[%s1497_s0 + $0xc] ss:$28 sps:$4 sm:$0xff]  }
   0xc   :  { %959 = vmatpush3.bf16.msra.mxu0 %v1115_v10  ;;  %v1132_v27 = vld [vmem:[%s1496_s1 + $0xb0] sm:$0xff]   ;;  %v1136_v31 = vld [vmem:[%s1496_s1 + $0xb8] sm:$0xff]   ;;  %v1143_v36 = vld [vmem:[%s1496_s1 + $0x140] sm:$0xff]   ;;  %696 = vmatprep.mubr.bf16.mxu1 %v1142_v35 }
   0xd   :  { %999 = vmatpush3.bf16.msra.mxu1 %v1116_v11  ;;  %960 = vmatprep.subr.bf16.mxu0 %v1117_v12  ;;  %v1137_v32 = vld [vmem:[%s1497_s0] ss:$28 sps:$4 sm:$0xff]   ;;  %v1145_v38 = vld [vmem:[%s1496_s1 + $0x148] sm:$0xff]   ;;  %v1151_v42 = vld [vmem:[%s1497_s0 + $0x38] ss:$28 sps:$4 sm:$0xff]  }
   0xe   :  { %1000 = vmatprep.subr.bf16.mxu1 %v1118_v13  ;;  %v1144_v37 = vld [vmem:[%s1496_s1 + $0x100] sm:$0xff]   ;;  %v1146_v39 = vld [vmem:[%s1496_s1 + $0x108] sm:$0xff]   ;;  %v1147_v40 = vld [vmem:[%s1497_s0 + $0x3c] ss:$28 sps:$4 sm:$0xff]  }
   0xf   :  { %v1149_v41 = vld [vmem:[%s1497_s0 + $0x44] ss:$28 sps:$4 sm:$0xff]   ;;  %v1153_v44 = vld [vmem:[%s1496_s1 + $0x150] sm:$0xff]   ;;  %v1155_v46 = vld [vmem:[%s1496_s1 + $0x158] sm:$0xff]  }
  0x10   :  { %961 = vmatpush3.bf16.msra.mxu0 %v1119_v14  ;;  %v1152_v43 = vld [vmem:[%s1497_s0 + $0x40] ss:$28 sps:$4 sm:$0xff]   ;;  %v1154_v45 = vld [vmem:[%s1496_s1 + $0x110] sm:$0xff]   ;;  %v1165_v54 = vld [vmem:[%s1496_s1 + $0x168] sm:$0xff]  }
  0x11   :  { %1001 = vmatpush3.bf16.msra.mxu1 %v1120_v15  ;;  %962 = vmatprep.subr.bf16.mxu0 %v1121_v16  ;;  %v1156_v47 = vld [vmem:[%s1496_s1 + $0x118] sm:$0xff]   ;;  %v1157_v48 = vld [vmem:[%s1497_s0 + $0x74] ss:$28 sps:$4 sm:$0xff]   ;;  %v1163_v51 = vld [vmem:[%s1496_s1 + $0x160] sm:$0xff]  }
  0x12   :  { %1002 = vmatprep.subr.bf16.mxu1 %v1122_v17  ;;  %v1159_v49 = vld [vmem:[%s1497_s0 + $0x7c] ss:$28 sps:$4 sm:$0xff]   ;;  %v1161_v50 = vld [vmem:[%s1497_s0 + $0x70] ss:$28 sps:$4 sm:$0xff]   ;;  %v1164_v53 = vld [vmem:[%s1496_s1 + $0x120] sm:$0xff]  }
  0x13   :  { %v1162_v52 = vld [vmem:[%s1497_s0 + $0x78] ss:$28 sps:$4 sm:$0xff]   ;;  %v1167_v55 = vld [vmem:[%s1497_s0 + $0xac] ss:$28 sps:$4 sm:$0xff]   ;;  %v1183_v3 = vld [vmem:[%s1496_s1 + $0x180] sm:$0xff]  }
  0x14   :  { %963 = vmatpush3.bf16.msra.mxu0 %v1123_v18  ;;  %v1169_v56 = vld [vmem:[%s1497_s0 + $0xb4] ss:$28 sps:$4 sm:$0xff]   ;;  %v1166_v57 = vld [vmem:[%s1496_s1 + $0x128] sm:$0xff]   ;;  %v1175_v62 = vld [vmem:[%s1496_s1 + $0x178] sm:$0xff]  }
  0x15   :  { %1003 = vmatpush3.bf16.msra.mxu1 %v1124_v19  ;;  %964 = vmatprep.subr.bf16.mxu0 %v1125_v20  ;;  %v1173_v58 = vld [vmem:[%s1496_s1 + $0x170] sm:$0xff]   ;;  %v1171_v59 = vld [vmem:[%s1497_s0 + $0xa8] ss:$28 sps:$4 sm:$0xff]   ;;  %v1182_v0 = vld [vmem:[%s1497_s0 + $0xbc] ss:$28 sps:$4 sm:$0xff]  }
  0x16   :  { %1004 = vmatprep.subr.bf16.mxu1 %v1126_v21  ;;  %v1172_v60 = vld [vmem:[%s1497_s0 + $0xb0] ss:$28 sps:$4 sm:$0xff]   ;;  %v1176_v1 = vld [vmem:[%s1496_s1 + $0x138] sm:$0xff]   ;;  %v1187_v7 = vld [vmem:[%s1497_s0 + $0x48] ss:$28 sps:$4 sm:$0xff]  }
  0x17   :  { %v1174_v61 = vld [vmem:[%s1496_s1 + $0x130] sm:$0xff]   ;;  %v1184_v5 = vld [vmem:[%s1497_s0 + $0x4c] ss:$28 sps:$4 sm:$0xff]   ;;  %v1189_v9 = vld [vmem:[%s1497_s0 + $0x84] ss:$28 sps:$4 sm:$0xff]  }
  0x18   :  { %965 = vmatpush3.bf16.msra.mxu0 %v1127_v22  ;;  %v1179_v63 = vld [vmem:[%s1497_s0 + $0x14] ss:$28 sps:$4 sm:$0xff]   ;;  %v1191_v10 = vld [vmem:[%s1497_s0 + $0x88] ss:$28 sps:$4 sm:$0xff]   ;;  %v1192_v11 = vld [vmem:[%s1497_s0 + $0x80] ss:$28 sps:$4 sm:$0xff]  }
  0x19   :  { %1005 = vmatpush3.bf16.msra.mxu1 %v1128_v23  ;;  %966 = vmatprep.subr.bf16.mxu0 %v1129_v24  ;;  %v1177_v2 = vld [vmem:[%s1497_s0 + $0x10] ss:$28 sps:$4 sm:$0xff]   ;;  %v1180_v4 = vld [vmem:[%s1497_s0 + $0xb8] ss:$28 sps:$4 sm:$0xff]   ;;  %v1193_v12 = vld [vmem:[%s1497_s0 + $0xc0] ss:$28 sps:$4 sm:$0xff]  }
  0x1a   :  { %1006 = vmatprep.subr.bf16.mxu1 %v1130_v25  ;;  %v1186_v6 = vld [vmem:[%s1497_s0 + $0x18] ss:$28 sps:$4 sm:$0xff]   ;;  %v1188_v8 = vld [vmem:[%s1497_s0 + $0x50] ss:$28 sps:$4 sm:$0xff]   ;;  %v872_v14 = vld [vmem:[%s1498_s2] ss:$0 sm:$0xff] }
  0x1c   :  { %967 = vmatpush3.bf16.msra.mxu0 %v1131_v26 }
  0x1d   :  { %1007 = vmatpush3.bf16.msra.mxu1 %v1132_v27  ;;  %968 = vmatprep.subr.bf16.mxu0 %v1133_v28 }
  0x1e   :  { %1008 = vmatprep.subr.bf16.mxu1 %v1134_v29 }
  0x20   :  { %969 = vmatpush3.bf16.msra.mxu0 %v1135_v30 }
  0x21   :  { %1009 = vmatpush3.bf16.msra.mxu1 %v1136_v31  ;;  %1034 = vmatprep.subr.bf16.mxu0 %v1143_v36 }
  0x22   :  { %1089 = vmatprep.subr.bf16.mxu1 %v1143_v36 }
  0x23   :  { %632 = vmatmul.mubr.bf16.vlgmr.msra.gmra.mrb[0].mxu0 %v1137_v32 }
  0x24   :  { %697 = vmatmul.mubr.bf16.vlgmr.msra.gmra.mrb[0].mxu1 %v1140_v34  ;;  %1035 = vmatpush3.bf16.msra.mxu0 %v1144_v37 }
  0x25   :  { %1097 = vmatpush3.bf16.msra.mxu1 %v1144_v37  ;;  %1036 = vmatprep.subr.bf16.mxu0 %v1145_v38 }
  0x26   :  { %1090 = vmatprep.subr.bf16.mxu1 %v1145_v38  ;;  %639 = vmatprep.mubr.bf16.mxu0 %v1147_v40 }
  0x27   :  { %704 = vmatprep.mubr.bf16.mxu1 %v1149_v41 }
  0x28   :  { %1037 = vmatpush3.bf16.msra.mxu0 %v1146_v39 }
  0x29   :  { %1098 = vmatpush3.bf16.msra.mxu1 %v1146_v39  ;;  %1038 = vmatprep.subr.bf16.mxu0 %v1153_v44 }
  0x2a   :  { %1091 = vmatprep.subr.bf16.mxu1 %v1153_v44 }
  0x2b   :  { %640 = vmatmul.mubr.bf16.gmra.mrb[4].mxu0 %v1151_v42 }
  0x2c   :  { %705 = vmatmul.mubr.bf16.gmra.mrb[4].mxu1 %v1152_v43  ;;  %1039 = vmatpush3.bf16.msra.mxu0 %v1154_v45 }
  0x2d   :  { %1099 = vmatpush3.bf16.msra.mxu1 %v1154_v45  ;;  %1040 = vmatprep.subr.bf16.mxu0 %v1155_v46 }
  0x2e   :  { %1092 = vmatprep.subr.bf16.mxu1 %v1155_v46  ;;  %647 = vmatprep.mubr.bf16.mxu0 %v1157_v48 }
  0x2f   :  { %712 = vmatprep.mubr.bf16.mxu1 %v1159_v49 }
  0x30   :  { %1041 = vmatpush3.bf16.msra.mxu0 %v1156_v47 }
  0x31   :  { %1100 = vmatpush3.bf16.msra.mxu1 %v1156_v47  ;;  %1042 = vmatprep.subr.bf16.mxu0 %v1163_v51 }
  0x32   :  { %1093 = vmatprep.subr.bf16.mxu1 %v1163_v51 }
  0x33   :  { %648 = vmatmul.mubr.bf16.gmra.mrb[8].mxu0 %v1161_v50 }
  0x34   :  { %713 = vmatmul.mubr.bf16.gmra.mrb[8].mxu1 %v1162_v52  ;;  %1043 = vmatpush3.bf16.msra.mxu0 %v1164_v53 }
  0x35   :  { %655 = vmatprep.mubr.bf16.mxu0 %v1167_v55  ;;  %1101 = vmatpush3.bf16.msra.mxu1 %v1164_v53 }
  0x36   :  { %1044 = vmatprep.subr.bf16.mxu0 %v1165_v54  ;;  %1094 = vmatprep.subr.bf16.mxu1 %v1165_v54 }
  0x37   :  { %720 = vmatprep.mubr.bf16.mxu1 %v1169_v56 }
  0x38   :  { %1045 = vmatpush3.bf16.msra.mxu0 %v1166_v57 }
  0x39   :  { %1102 = vmatpush3.bf16.msra.mxu1 %v1166_v57  ;;  %1046 = vmatprep.subr.bf16.mxu0 %v1173_v58 }
  0x3a   :  { %1095 = vmatprep.subr.bf16.mxu1 %v1173_v58 }
  0x3b   :  { %656 = vmatmul.mubr.bf16.gmra.mrb[12].mxu0 %v1171_v59 }
  0x3c   :  { %721 = vmatmul.mubr.bf16.gmra.mrb[12].mxu1 %v1172_v60  ;;  %761 = vmatprep.mubr.bf16.mxu0 %v1179_v63 }
  0x3d   :  { %1047 = vmatpush3.bf16.msra.mxu0 %v1174_v61  ;;  %1103 = vmatpush3.bf16.msra.mxu1 %v1174_v61 }
  0x3e   :  { %1048 = vmatprep.subr.bf16.mxu0 %v1175_v62  ;;  %1096 = vmatprep.subr.bf16.mxu1 %v1175_v62 }
  0x3f   :  { %785 = vmatprep.mubr.bf16.mxu1 %v1182_v0 }
  0x41   :  { %1049 = vmatpush3.bf16.msra.mxu0 %v1176_v1  ;;  %1104 = vmatpush3.bf16.msra.mxu1 %v1176_v1 }
  0x42   :  { %1079 = vmatprep.subr.bf16.mxu1 %v1183_v3 }
  0x44   :  { %762 = vmatmul.mubr.bf16.vlgmr.msra.gmra.mrb[16].mxu0 %v1177_v2  ;;  %786 = vmatmul.mubr.bf16.vlgmr.msra.gmra.mrb[16].mxu1 %v1180_v4 }
  0x45   :  { %769 = vmatprep.mubr.bf16.mxu0 %v1184_v5  ;;  %1080 = vmatpush3.bf16.msra.mxu1 %v1183_v3 }
  0x46   :  { %1081 = vmatprep.mubr.msk.bf16.mxu1 %vm586_vm0, %v1186_v6 }
  0x4c   :  { %770 = vmatmul.mubr.bf16.gmra.mrb[20].mxu0 %v1187_v7  ;;  %1082 = vmatmul.mubr.msk.bf16.vlgmr.msra.gmra.mrb[20].mxu1 %vm586_vm0, %v1188_v8 }
  0x4d   :  { %777 = vmatprep.mubr.bf16.mxu0 %v1189_v9  ;;  %1085 = vmatprep.mubr.msk.bf16.mxu1 %vm586_vm0, %v1191_v10 }
  0x54   :  { %778 = vmatmul.mubr.bf16.gmra.mrb[24].mxu0 %v1192_v11  ;;  %1086 = vmatmul.mubr.msk.bf16.gmra.mrb[24].mxu1 %vm586_vm0, %v1193_v12 }
  0xf6   :  { %v970_v13 = vpop.f32.mrb[0].mxu0 }
  0xf7   :  { %v971_v15 = vpop.f32.mrb[1].mxu0  ;;  %v1010_v16 = vpop.f32.mrb[0].mxu1 }
  0xf8   :  { %v972_v17 = vadd.f32 %v971_v15, %v970_v13  ;;  %v973_v18 = vpop.f32.mrb[2].mxu0  ;;  %v1011_v19 = vpop.f32.mrb[1].mxu1 }
  0xf9   :  { %v974_v20 = vpop.f32.mrb[3].mxu0  ;;  %v1012_v21 = vadd.f32 %v1011_v19, %v1010_v16  ;;  %v1013_v22 = vpop.f32.mrb[2].mxu1 }
  0xfa   :  { %v634_v23 = vadd.f32 %v972_v17, %v872_v14  ;;  %v975_v24 = vadd.f32 %v974_v20, %v973_v18  ;;  %v1014_v25 = vpop.f32.mrb[3].mxu1 }
  0xfb   :  { %v1015_v26 = vadd.f32 %v1014_v25, %v1013_v22 }
  0xfc   :  { %v637_v27 = vadd.f32 %v975_v24, %v872_v14  ;;  %v699_v28 = vadd.f32 %v1012_v21, %v634_v23 }
  0xfe   :  { %v1452_v29 = vadd.f32 %v1015_v26, %v637_v27  ;;  %v976_v30 = vpop.f32.mrb[4].mxu0 }
  0xff   :  { %v977_v31 = vpop.f32.mrb[5].mxu0  ;;  %v1016_v32 = vpop.f32.mrb[4].mxu1 }
 0x100   :  { %v978_v33 = vadd.f32 %v977_v31, %v976_v30  ;;  %v979_v34 = vpop.f32.mrb[6].mxu0  ;;  %v1017_v35 = vpop.f32.mrb[5].mxu1 }
 0x101   :  { %v980_v36 = vpop.f32.mrb[7].mxu0  ;;  %v1018_v37 = vadd.f32 %v1017_v35, %v1016_v32  ;;  %v1019_v38 = vpop.f32.mrb[6].mxu1 }
 0x102   :  { %v642_v39 = vadd.f32 %v978_v33, %v872_v14  ;;  %v981_v40 = vadd.f32 %v980_v36, %v979_v34  ;;  %v1020_v41 = vpop.f32.mrb[7].mxu1 }
 0x103   :  { %v1021_v42 = vadd.f32 %v1020_v41, %v1019_v38 }
 0x104   :  { %v645_v43 = vadd.f32 %v981_v40, %v872_v14  ;;  %v707_v44 = vadd.f32 %v1018_v37, %v642_v39 }
 0x106   :  { %v1454_v45 = vadd.f32 %v1021_v42, %v645_v43  ;;  %v982_v46 = vpop.f32.mrb[8].mxu0 }
 0x107   :  { %v983_v47 = vpop.f32.mrb[9].mxu0  ;;  %v1022_v48 = vpop.f32.mrb[8].mxu1 }
 0x108   :  { %v984_v49 = vadd.f32 %v983_v47, %v982_v46  ;;  %v985_v50 = vpop.f32.mrb[10].mxu0  ;;  %v1023_v51 = vpop.f32.mrb[9].mxu1 }
 0x109   :  { %v986_v52 = vpop.f32.mrb[11].mxu0  ;;  %v1024_v53 = vadd.f32 %v1023_v51, %v1022_v48  ;;  %v1025_v54 = vpop.f32.mrb[10].mxu1 }
 0x10a   :  { %v650_v55 = vadd.f32 %v984_v49, %v872_v14  ;;  %v987_v56 = vadd.f32 %v986_v52, %v985_v50  ;;  %v1026_v57 = vpop.f32.mrb[11].mxu1 }
 0x10b   :  { %v1027_v58 = vadd.f32 %v1026_v57, %v1025_v54 }
 0x10c   :  { %v653_v59 = vadd.f32 %v987_v56, %v872_v14  ;;  %v1456_v60 = vadd.f32 %v1024_v53, %v650_v55 }
 0x10e   :  { %v1458_v61 = vadd.f32 %v1027_v58, %v653_v59  ;;  %v988_v62 = vpop.f32.mrb[12].mxu0 }
 0x10f   :  { %v989_v63 = vpop.f32.mrb[13].mxu0  ;;  %v1028_v0 = vpop.f32.mrb[12].mxu1 }
 0x110   :  { %v990_v1 = vadd.f32 %v989_v63, %v988_v62  ;;  %v991_v2 = vpop.f32.mrb[14].mxu0  ;;  %v1029_v3 = vpop.f32.mrb[13].mxu1 }
 0x111   :  { %v992_v4 = vpop.f32.mrb[15].mxu0  ;;  %v1030_v5 = vadd.f32 %v1029_v3, %v1028_v0  ;;  %v1031_v6 = vpop.f32.mrb[14].mxu1 }
 0x112   :  { %v658_v7 = vadd.f32 %v990_v1, %v872_v14  ;;  %v993_v8 = vadd.f32 %v992_v4, %v991_v2  ;;  %v1032_v9 = vpop.f32.mrb[15].mxu1 }
 0x113   :  { %v1033_v10 = vadd.f32 %v1032_v9, %v1031_v6 }
 0x114   :  { %v661_v11 = vadd.f32 %v993_v8, %v872_v14  ;;  %v723_v12 = vadd.f32 %v1030_v5, %v658_v7 }
 0x116   :  { %v726_v13 = vadd.f32 %v1033_v10, %v661_v11 }
 0x117   :  { %v1050_v15 = vpop.f32.mrb[16].mxu0  ;;  %v1068_v16 = vpop.f32.mrb[16].mxu1 }
 0x118   :  { %v1051_v17 = vpop.f32.mrb[17].mxu0  ;;  %v1069_v19 = vpop.f32.mrb[17].mxu1 }
 0x119   :  { %v1052_v18 = vadd.f32 %v1051_v17, %v1050_v15  ;;  %v1053_v20 = vpop.f32.mrb[18].mxu0  ;;  %v1070_v21 = vadd.f32 %v1069_v19, %v1068_v16  ;;  %v1071_v22 = vpop.f32.mrb[18].mxu1 }
 0x11a   :  { %v1054_v23 = vpop.f32.mrb[19].mxu0  ;;  %v1072_v25 = vpop.f32.mrb[19].mxu1 }
 0x11b   :  { %v1055_v24 = vadd.f32 %v1054_v23, %v1053_v20  ;;  %v764_v26 = vadd.f32 %v1052_v18, %v699_v28  ;;  %v1073_v27 = vadd.f32 %v1072_v25, %v1071_v22  ;;  %v788_v30 = vadd.f32 %v1070_v21, %v723_v12 }
 0x11d   :  { %v767_v31 = vadd.f32 %v1055_v24, %v1452_v29  ;;  %v791_v32 = vadd.f32 %v1073_v27, %v726_v13 }
 0x11f   :  { %v1056_v14 = vpop.f32.mrb[20].mxu0  ;;  %v1083_v33 = vpop.f32.mrb[20].mxu1 }
 0x120   :  { %v1057_v34 = vpop.f32.mrb[21].mxu0  ;;  %v828_v36 = vpop.f32.mrb[21].mxu1 }
 0x121   :  { %v1058_v35 = vadd.f32 %v1057_v34, %v1056_v14  ;;  %v1059_v37 = vpop.f32.mrb[22].mxu0  ;;  %v829_v38 = vadd.f32 %v828_v36, %v764_v26  ;;  %v1084_v39 = vpop.f32.mrb[22].mxu1 }
 0x122   :  { %v1060_v40 = vpop.f32.mrb[23].mxu0  ;;  %v831_v43 = vpop.f32.mrb[23].mxu1 }
 0x123   :  { %v772_v41 = vadd.f32 %v1058_v35, %v707_v44  ;;  %v1061_v42 = vadd.f32 %v1060_v40, %v1059_v37  ;;  %860 = vst.msk [vmem:[%s1499_s3] sm:$0xff] %vm859_vm1, %v829_v38  ;;  %v832_v28 = vadd.f32 %v831_v43, %v767_v31 }
 0x125   :  { %v837_v29 = vadd.f32 %v1083_v33, %v772_v41  ;;  %v775_v46 = vadd.f32 %v1061_v42, %v1454_v45  ;;  %861 = vst.msk [vmem:[%s1499_s3 + $0x8] sm:$0xff] %vm859_vm1, %v832_v28 }
 0x127   :  { %862 = vst.msk [vmem:[%s1499_s3 + $0x10] sm:$0xff] %vm859_vm1, %v837_v29  ;;  %v840_v44 = vadd.f32 %v1084_v39, %v775_v46  ;;  %v1062_v47 = vpop.f32.mrb[24].mxu0  ;;  %v1087_v48 = vpop.f32.mrb[24].mxu1 }
 0x128   :  { %v1063_v49 = vpop.f32.mrb[25].mxu0  ;;  %v853_v45 = vadd.f32 %v1087_v48, %v788_v30  ;;  %v844_v51 = vpop.f32.mrb[25].mxu1 }
 0x129   :  { %863 = vst.msk [vmem:[%s1499_s3 + $0x18] sm:$0xff] %vm859_vm1, %v840_v44  ;;  %v1064_v50 = vadd.f32 %v1063_v49, %v1062_v47  ;;  %v1065_v52 = vpop.f32.mrb[26].mxu0  ;;  %v1088_v53 = vpop.f32.mrb[26].mxu1 }
 0x12a   :  { %v1066_v54 = vpop.f32.mrb[27].mxu0  ;;  %866 = vst.msk [vmem:[%s1499_s3 + $0x30] sm:$0xff] %vm859_vm1, %v853_v45  ;;  %v856_v56 = vadd.f32 %v1088_v53, %v791_v32  ;;  %v847_v58 = vpop.f32.mrb[27].mxu1 }
 0x12b   :  { %v780_v55 = vadd.f32 %v1064_v50, %v1456_v60  ;;  %v1067_v57 = vadd.f32 %v1066_v54, %v1065_v52 }
 0x12c   :  { %867 = vst.msk [vmem:[%s1499_s3 + $0x38] sm:$0xff] %vm859_vm1, %v856_v56 }
 0x12d   :  { %v845_v59 = vadd.f32 %v844_v51, %v780_v55  ;;  %v783_v62 = vadd.f32 %v1067_v57, %v1458_v61 }
 0x12f   :  { %864 = vst.msk [vmem:[%s1499_s3 + $0x20] sm:$0xff] %vm859_vm1, %v845_v59  ;;  %v848_v63 = vadd.f32 %v847_v58, %v783_v62 }
 0x131   :  { %865 = vst.msk [vmem:[%s1499_s3 + $0x28] sm:$0xff] %vm859_vm1, %v848_v63 }

</bundles_post_ra>
